<compile_context>
chip_gen: v5e
topology: v5e:2x2
jax: 0.10.0
libtpu: 0.0.40
codegen_flags: <defaults>
</compile_context>

<pallas_src>
import functools

import jax
import jax.numpy as jnp
import numpy as np
from jax.experimental import pallas as pl
from jax.experimental.pallas import tpu as pltpu


def _round_up(x, m):
    return (x + m - 1) // m * m


# ----------------------------- Pallas kernels --------------------------------

def _epilogue(acc, b_ref, o_ref, relu):
    acc = acc + b_ref[...]                  # bias broadcast along lanes
    if relu:
        acc = jnp.maximum(acc, 0.0)
    o_ref[...] = acc.astype(o_ref.dtype)


def _single_k_kernel(xT_ref, w_ref, b_ref, oT_ref, *, relu):
    """Whole K fits in one block: dot + bias + ReLU straight to the output.

    xT_ref : (k_pad, tm)   bf16 im2col patches (M on lanes)
    w_ref  : (Cout, k_pad) bf16 BN-folded weights (VMEM-resident)
    b_ref  : (Cout, 1)     f32 folded bias column
    oT_ref : (Cout, tm)    lane-dense output tile
    """
    acc = jnp.dot(w_ref[...], xT_ref[...], preferred_element_type=jnp.float32)
    _epilogue(acc, b_ref, oT_ref, relu)


def _multi_k_kernel(xT_ref, w_ref, b_ref, oT_ref, acc_ref, *, relu):
    """K-tiled reduction; weights stay VMEM-resident (constant block index).

    xT_ref : (tk, tm)           current K slab of the patches
    w_ref  : (n_k, Cout, tk)    full weight, fetched once
    acc_ref: (Cout, tm)         f32 accumulator scratch across the K axis
    """
    j = pl.program_id(1)
    prod = jnp.dot(w_ref[j], xT_ref[...], preferred_element_type=jnp.float32)

    @pl.when(j == 0)
    def _first():
        acc_ref[...] = prod                 # write-only first step (no RMW)

    @pl.when(j > 0)
    def _rest():
        acc_ref[...] += prod

    @pl.when(j == pl.num_programs(1) - 1)
    def _last():
        _epilogue(acc_ref[...], b_ref, oT_ref, relu)


# ------------------------------ tiling policy --------------------------------

_TM_CAP = 1024   # bf16 (512,1024) x-tile x 2 buffers = 2 MiB -> fine on v5e too
_TK_CAP = 512


def _select_tiles(m, kdim):
    """Pick (tm, m_pad, tk, k_pad) minimizing padding, lane-dense, megacore-able."""
    m_128 = _round_up(m, 128)
    tm = min(_TM_CAP, m_128)
    # v7x megacore: keep >= 2 M tiles when possible so both TensorCores get work.
    if m_128 // tm < 2 and m_128 >= 256:
        tm = 128 * ((m_128 // 128) // 2)
    m_pad = _round_up(m, tm)

    if kdim <= _TK_CAP:
        tk = _round_up(kdim, 8)             # single full-extent K block
        k_pad = tk
    else:
        k_pad = _round_up(kdim, 128)
        units = k_pad // 128
        # largest divisor of k_pad that is a multiple of 128 and <= 512
        tk_units = max(u for u in range(1, _TK_CAP // 128 + 1) if units % u == 0)
        tk = tk_units * 128
    return tm, m_pad, tk, k_pad


# ------------------------------ matmul wrapper -------------------------------

def _matmul_bias_act(xT, w2d, bias, relu, tm, tk):
    """relu(w2d @ xT + bias), transposed output (Cout, M_pad), f32.

    xT  : (k_pad, m_pad) bf16 im2col patches (already padded)
    w2d : (Cout, k_pad)  bf16 BN-scale-folded weights (already padded)
    bias: (Cout,)        f32 folded bias
    """
    k_pad, m_pad = xT.shape
    cout = w2d.shape[0]
    n_m, n_k = m_pad // tm, k_pad // tk
    b_col = bias.reshape(cout, 1).astype(jnp.float32)

    if n_k == 1:
        return pl.pallas_call(
            functools.partial(_single_k_kernel, relu=relu),
            out_shape=jax.ShapeDtypeStruct((cout, m_pad), jnp.float32),
            grid=(n_m,),
            in_specs=[
                pl.BlockSpec((k_pad, tm), lambda i: (0, i)),     # patches
                pl.BlockSpec((cout, k_pad), lambda i: (0, 0)),   # weights, 1 DMA
                pl.BlockSpec((cout, 1), lambda i: (0, 0)),       # bias, 1 DMA
            ],
            out_specs=pl.BlockSpec((cout, tm), lambda i: (0, i)),
            compiler_params=pltpu.CompilerParams(
                dimension_semantics=("parallel",)),
        )(xT, w2d, b_col)

    # K-tiled path: reshape weights so the kernel picks its K slab with a cheap
    # leading-dim index; the whole weight stays resident in VMEM (one DMA).
    w3d = jnp.transpose(w2d.reshape(cout, n_k, tk), (1, 0, 2))   # (n_k, Cout, tk)
    return pl.pallas_call(
        functools.partial(_multi_k_kernel, relu=relu),
        out_shape=jax.ShapeDtypeStruct((cout, m_pad), jnp.float32),
        grid=(n_m, n_k),
        in_specs=[
            pl.BlockSpec((tk, tm), lambda i, j: (j, i)),          # patches
            pl.BlockSpec((n_k, cout, tk), lambda i, j: (0, 0, 0)),  # weights, 1 DMA
            pl.BlockSpec((cout, 1), lambda i, j: (0, 0)),         # bias, 1 DMA
        ],
        out_specs=pl.BlockSpec((cout, tm), lambda i, j: (0, i)),
        scratch_shapes=[pltpu.VMEM((cout, tm), jnp.float32)],
        compiler_params=pltpu.CompilerParams(
            dimension_semantics=("parallel", "arbitrary")),
    )(xT, w3d, b_col)


# ------------------------------ forward wrapper ------------------------------

def _pair(v):
    return (v, v) if isinstance(v, int) else tuple(v)


def convbnrelu_forward(x_nchw, params, *, s=1, p=0, d=1, g=1,
                       bn=True, relu=True):
    """Forward of convbnrelu: Conv2d(k,s,p,dilation=d,groups=g,bias) [+BN] [+ReLU].

    x_nchw: (N, Cin, H, W);  params["weight"]: (Cout, Cin, kh, kw) (PyTorch OIHW).
    """
    if g != 1:
        raise NotImplementedError  # TODO(synk): grouped conv (groups > 1) not implemented.
    sh, sw = _pair(s)
    ph, pw = _pair(p)
    dh, dw = _pair(d)

    weight = params["weight"]
    conv_bias = params.get("bias")
    cout, cin_w, kh, kw = weight.shape
    n, cin, h, w = x_nchw.shape
    assert cin == cin_w

    # --- fold BN (inference mode) + conv bias; fold the scale into weights ---
    w2d = jnp.transpose(weight, (0, 2, 3, 1)).reshape(cout, kh * kw * cin)
    w2d = w2d.astype(jnp.float32)
    if bn:
        eps = params.get("bn_eps", 1e-5)
        scale = params["bn_gamma"] * jax.lax.rsqrt(params["bn_var"] + eps)
        bias = params["bn_beta"] - params["bn_mean"] * scale
        if conv_bias is not None:
            bias = bias + conv_bias * scale
        w2d = w2d * scale[:, None]
    else:
        bias = conv_bias if conv_bias is not None else jnp.zeros((cout,), jnp.float32)
    w2d = w2d.astype(jnp.bfloat16)          # MXU-native, half the weight bytes

    # --- output geometry + tile selection ---
    ho = (h + 2 * ph - dh * (kh - 1) - 1) // sh + 1
    wo = (w + 2 * pw - dw * (kw - 1) - 1) // sw + 1
    m = n * ho * wo
    kdim = kh * kw * cin
    tm, m_pad, tk, k_pad = _select_tiles(m, kdim)

    # --- im2col directly in (K, M) layout, bf16, K-padding folded in ---------
    xp = jnp.pad(x_nchw.astype(jnp.bfloat16),
                 ((0, 0), (0, 0), (ph, ph), (pw, pw)))
    xp = jnp.transpose(xp, (1, 0, 2, 3))                       # (Cin, N, Hp, Wp)
    taps = []
    for i in range(kh):
        for j in range(kw):
            h0, w0 = i * dh, j * dw
            t = xp[:, :, h0:h0 + (ho - 1) * sh + 1:sh,
                   w0:w0 + (wo - 1) * sw + 1:sw]               # (Cin, N, Ho, Wo)
            taps.append(t.reshape(cin, m))
    if k_pad > kdim:                     # fold K zero-padding into the concat
        taps.append(jnp.zeros((k_pad - kdim, m), jnp.bfloat16))
    xT = taps[0] if len(taps) == 1 else jnp.concatenate(taps, axis=0)
    if m_pad > m:                        # usually 0 (M a multiple of 128)
        xT = jnp.pad(xT, ((0, 0), (0, m_pad - m)))
    if k_pad > kdim:
        w2d = jnp.pad(w2d, ((0, 0), (0, k_pad - kdim)))

    out_t = _matmul_bias_act(xT, w2d, bias, relu, tm, tk)      # (Cout, M_pad) f32
    out_t = out_t[:, :m]
    return jnp.transpose(out_t.reshape(cout, n, ho, wo), (1, 0, 2, 3))


# -------------------------- pure-JAX reference -------------------------------

def ref_convbnrelu(x_nchw, params, *, s=1, p=0, d=1, g=1, bn=True, relu=True):
    sh, sw = _pair(s)
    ph, pw = _pair(p)
    dh, dw = _pair(d)
    y = jax.lax.conv_general_dilated(
        x_nchw, params["weight"], window_strides=(sh, sw),
        padding=[(ph, ph), (pw, pw)], rhs_dilation=(dh, dw),
        feature_group_count=g,
        dimension_numbers=("NCHW", "OIHW", "NCHW"))
    if params.get("bias") is not None:
        y = y + params["bias"].reshape(1, -1, 1, 1)
    if bn:
        eps = params.get("bn_eps", 1e-5)
        scale = params["bn_gamma"] * jax.lax.rsqrt(params["bn_var"] + eps)
        shift = params["bn_beta"] - params["bn_mean"] * scale
        y = y * scale.reshape(1, -1, 1, 1) + shift.reshape(1, -1, 1, 1)
    if relu:
        y = jnp.maximum(y, 0.0)
    return y


# ------------------------------ parameters -----------------------------------

def init_params(key, cin, cout, kh, kw, *, use_bias=False, use_bn=True):
    ks = iter(jax.random.split(key, 8))
    prm = {"weight": (0.2 * jax.random.normal(
        next(ks), (cout, cin, kh, kw))).astype(jnp.float32)}
    if use_bias:
        prm["bias"] = (0.1 * jax.random.normal(next(ks), (cout,))).astype(jnp.float32)
    if use_bn:
        prm["bn_gamma"] = jax.random.uniform(
            next(ks), (cout,), minval=0.5, maxval=1.5).astype(jnp.float32)
        prm["bn_beta"] = (0.1 * jax.random.normal(next(ks), (cout,))).astype(jnp.float32)
        prm["bn_mean"] = (0.1 * jax.random.normal(next(ks), (cout,))).astype(jnp.float32)
        prm["bn_var"] = jax.random.uniform(
            next(ks), (cout,), minval=0.5, maxval=1.5).astype(jnp.float32)
        prm["bn_eps"] = 1e-5
    return prm


# --------------------------------- main ---------------------------------------

if __name__ == "__main__":
    key = jax.random.PRNGKey(0)
    kx1, kx2, kx3, kp1, kp2, kp3, kp4, kp5 = jax.random.split(key, 8)

    x_small = jax.random.normal(kx1, (2, 16, 16, 16), dtype=jnp.float32)
    x_wide = jax.random.normal(kx2, (2, 80, 16, 16), dtype=jnp.float32)
    x_odd = jax.random.normal(kx3, (1, 16, 15, 15), dtype=jnp.float32)

    cases = [
        # 1) module defaults: convbnrelu(16, 32)  (k=1, s=1, p=0, bn+relu)
        (x_small, init_params(kp1, 16, 32, 1, 1),
         dict(s=1, p=0, d=1, g=1, bn=True, relu=True)),
        # 2) 3x3 SAME conv: convbnrelu(16, 32, k=3, p=1)
        (x_small, init_params(kp2, 16, 32, 3, 3),
         dict(s=1, p=1, d=1, g=1, bn=True, relu=True)),
        # 3) strided 3x3, K = 720 > 512 -> exercises the K-reduction grid axis
        (x_wide, init_params(kp3, 80, 64, 3, 3),
         dict(s=2, p=1, d=1, g=1, bn=True, relu=True)),
        # 4) conv only: convbnrelu(16, 8, bias=True, bn=False, relu=False)
        (x_small, init_params(kp4, 16, 8, 1, 1, use_bias=True, use_bn=False),
         dict(s=1, p=0, d=1, g=1, bn=False, relu=False)),
        # 5) odd spatial size (M not a multiple of 128) -> exercises M padding
        (x_odd, init_params(kp5, 16, 32, 3, 3),
         dict(s=1, p=1, d=1, g=1, bn=True, relu=True)),
    ]

    for x, prm, cfg in cases:
        fwd = jax.jit(functools.partial(convbnrelu_forward, **cfg))
        y = jax.block_until_ready(fwd(x, prm))
        y_ref = ref_convbnrelu(x, prm, **cfg)
        assert y.shape == y_ref.shape
        # bf16 operands (f32 accumulation) vs. pure-f32 reference -> looser tol.
        np.testing.assert_allclose(np.asarray(y), np.asarray(y_ref),
                                   rtol=2e-2, atol=5e-2)

    print("KERNEL_OK")
</pallas_src>

<mosaic_0001>
module attributes {stable_mosaic.version = 11 : i64} {
  func.func @_single_k_kernel(%arg0: i32, %arg1: memref<16x256xbf16, #tpu.memory_space<vmem>>, %arg2: memref<32x16xbf16, #tpu.memory_space<vmem>>, %arg3: memref<32x1xf32, #tpu.memory_space<vmem>>, %arg4: memref<32x256xf32, #tpu.memory_space<vmem>>) attributes {dimension_semantics = [#tpu.dimension_semantics<parallel>], iteration_bounds = array<i64: 2>, scalar_prefetch = 0 : i64, scratch_operands = 0 : i64, tpu.core_type = #tpu.core_type<tc>, window_params = [{transform_indices = @transform_0, window_bounds = array<i64: 16, 256>}, {pipeline_mode = #tpu.pipeline_mode<synchronous>, transform_indices = @transform_1, window_bounds = array<i64: 32, 16>}, {pipeline_mode = #tpu.pipeline_mode<synchronous>, transform_indices = @transform_2, window_bounds = array<i64: 32, 1>}, {transform_indices = @transform_3, window_bounds = array<i64: 32, 256>}]} {
    %c0 = arith.constant 0 : index
    %c0_0 = arith.constant 0 : index
    %0 = vector.load %arg2[%c0, %c0_0] : memref<32x16xbf16, #tpu.memory_space<vmem>>, vector<32x16xbf16>
    %c0_1 = arith.constant 0 : index
    %c0_2 = arith.constant 0 : index
    %1 = vector.load %arg1[%c0_1, %c0_2] : memref<16x256xbf16, #tpu.memory_space<vmem>>, vector<16x256xbf16>
    %cst = arith.constant dense<0.000000e+00> : vector<32x256xf32>
    %2 = tpu.matmul %0, %1, %cst {dimension_numbers = #tpu.dot_dimension_numbers<[1], [0], [0], [1], [0, 0, 1, 1], [], []>} : vector<32x16xbf16>, vector<16x256xbf16>, vector<32x256xf32> -> vector<32x256xf32>
    %c0_3 = arith.constant 0 : index
    %c0_4 = arith.constant 0 : index
    %3 = vector.load %arg3[%c0_3, %c0_4] : memref<32x1xf32, #tpu.memory_space<vmem>>, vector<32x1xf32>
    %4 = vector.broadcast %3 : vector<32x1xf32> to vector<32x256xf32>
    %5 = arith.addf %2, %4 : vector<32x256xf32>
    %cst_5 = arith.constant 0.000000e+00 : f32
    %6 = vector.broadcast %cst_5 : f32 to vector<32x256xf32>
    %7 = arith.maximumf %5, %6 : vector<32x256xf32>
    %c0_6 = arith.constant 0 : index
    %c0_7 = arith.constant 0 : index
    %8 = vector.load %arg4[%c0_6, %c0_7] : memref<32x256xf32, #tpu.memory_space<vmem>>, vector<32x256xf32>
    tpu.vector_store %arg4[%c0_6, %c0_7], %7 {strides = array<i32>} : memref<32x256xf32, #tpu.memory_space<vmem>>, vector<32x256xf32>,
    return
  }
  func.func @transform_0(%arg0: i32) -> (i32, i32) {
    %c0_i32 = arith.constant 0 : i32
    %c0_i32_0 = arith.constant 0 : i32
    return %c0_i32, %arg0 : i32, i32
  }
  func.func @transform_1(%arg0: i32) -> (i32, i32) {
    %c0_i32 = arith.constant 0 : i32
    %c0_i32_0 = arith.constant 0 : i32
    %c0_i32_1 = arith.constant 0 : i32
    return %c0_i32, %c0_i32_0 : i32, i32
  }
  func.func @transform_2(%arg0: i32) -> (i32, i32) {
    %c0_i32 = arith.constant 0 : i32
    %c0_i32_0 = arith.constant 0 : i32
    %c0_i32_1 = arith.constant 0 : i32
    return %c0_i32, %c0_i32_0 : i32, i32
  }
  func.func @transform_3(%arg0: i32) -> (i32, i32) {
    %c0_i32 = arith.constant 0 : i32
    %c0_i32_0 = arith.constant 0 : i32
    return %c0_i32, %arg0 : i32, i32
  }
}

</mosaic_0001>

<bundles_post_ra>
// kernel: convbnrelu_forward.1
= control target key start
LH: loop header
LB: loop body
LE: loop exit
PB: predicated region body
PF: predicated region fallthrough
CT: control target
= control target key end

     0   :  { %s531_s12 = smov 0   ;;  %s533_s13 = smov 0   ;;  %s631_s0 = inlined_call_operand.vmem [shape: bf16[16,512], index: 0, kind: input, shape index: {}]   ;;  %s632_s1 = inlined_call_operand.vmem [shape: bf16[32,16], index: 1, kind: input, shape index: {}]   ;;  %s633_s2 = inlined_call_operand.vmem [shape: f32[32,1], index: 2, kind: input, shape index: {}]   ;;  %s634_s3 = inlined_call_operand.vmem [shape: f32[32,512], index: 3, kind: output, shape index: {}]  }
   0x1   :  { %s535_s14 = smov 0  }
   0x2 LB: > { %s416_s15 = sadd.s32 4294967295, %s508_s14   ;;  %s548_s16 = sadd.s32 1, %s508_s14   ;;  %s508_s14 = sphi %s535_s14, %s638_s14   ;;  %s504_s13 = sphi %s533_s13, %s637_s13   ;;  %s500_s12 = sphi %s531_s12, %s636_s12  }
   0x3   : > { %s17_s17 = ssub.s32 %s508_s14, %s548_s16  ;;  %s20_s18 = sadd.s32 1, %s504_s13 }
   0x4   : > { %p18_p0 = scmp.eq.s32.totalorder %s17_s17, 0  ;;  %p27_p1 = scmp.ne.s32.totalorder %s504_s13, %s500_s12 }
   0x5   : > { %p28_p2 = scmp.eq.s32.totalorder %s508_s14, 0  ;;  %p99_p3 = scmp.eq.s32.totalorder %s416_s15, 1 }
   0x6   : > { %s559_s19 = scalar_select %p18_p0, %s504_s13, %s20_s18  }
   0x7   : > { %p29_p4 = por %p28_p2, %p27_p1  ;;  %p561_p5 = por %p99_p3, %p27_p1 }
   0x8   : > { %p419_p6 = scmp.ge.s32.totalorder %s508_s14, 2 }
   0xa   : > { %127 = sbr.rel (%p419_p6) target bundleno = 21 (0x15), region = 24 }
   0xf   : > { %130 = sbr.rel (!%p29_p4) target bundleno = 21 (0x15), region = 28  ;;  %s132_s21 = sand.u32 (%p29_p4), 1, %s504_s13  }
  0x10   : > { %s451_s22 = sshll.u32 (%p29_p4), %s508_s14, 3  ;;  %s420_s23 = sshll.u32 (%p29_p4), %s132_s21, 4 }
  0x11   : > { %s137_s26 = scalar_lea.vmem (%p29_p4), %s631_s0, %s451_s22  ;;  %s134_s27 = scalar_lea.vmem (%p29_p4), [#allocation2], %s420_s23 }
  0x12   : > { %v168_v0 = vld [vmem:[%s137_s26] sm:$0xff] (%p29_p4)  ;;  %v170_v1 = vld [vmem:[%s137_s26 + $0x10] sm:$0xff] (%p29_p4) }
  0x13   : > { %169 = vst [vmem:[%s134_s27] sm:$0xff] (%p29_p4), %v168_v0 }
  0x14   : > { %171 = vst [vmem:[%s134_s27 + $0x8] sm:$0xff] %v170_v1 }
  0x15 PF: > { %p423_p7 = scmp.ge.s32.totalorder %s508_s14, 1  ;;  %p176_p8 = scmp.lt.s32.totalorder %s508_s14, 3 }
  0x17   : > { %p177_p9 = pnand %p423_p7, %p176_p8 }
  0x18   : > { %s183_s28 = sand.u32 (!%p177_p9), 1, %s500_s12  }
  0x19   : > { %180 = sbr.rel (%p177_p9) target bundleno = 191 (0xbf), region = 66  ;;  %s424_s4 = sshll.u32 (!%p177_p9), %s183_s28, 4 }
  0x1a   : > { %s185_s7 = scalar_lea.vmem (!%p177_p9), [#allocation2], %s424_s4  ;;  %s425_s23 = sshll.u32 (!%p177_p9), %s183_s28, 6 }
  0x1b   : > { %s596_s24 = scalar_lea.vmem (!%p177_p9), [#allocation3], %s425_s23 }
  0x1e   : > { %v216_v2 = vld [vmem:[%s633_s2 + $0x10] sm:$0xff]  ;;  %v510_v3 = vmov 0   ;;  %v214_v4 = vld [vmem:[%s633_s2] sm:$0xff]  ;;  %v455_v6 = vld [vmem:[%s185_s7 + $0x4] sm:$0xf0]  ;;  %vm258_vm0 = vcmask 130048  }
  0x1f   : > { %485 = vset.pattern.permute.xlu1 %v510_v3  ;;  %484 = vset.pattern.permute.xlu0 %v510_v3  ;;  %v436_v5 = vld [vmem:[%s185_s7] sm:$0xf]  ;;  %v454_v7 = vld [vmem:[%s185_s7 + $0x4] sm:$0xf]  ;;  %v438_v9 = vld [vmem:[%s185_s7 + $0x8] sm:$0xf0] }
  0x20   : > { %230 = vperm.xlu1 %485, %v216_v2   ;;  %220 = vperm.xlu0 %484, %v214_v4   ;;  %v437_v8 = vor.u32 %v455_v6, %v436_v5  ;;  %v441_v10 = vor.u32 %v454_v7, %v438_v9  ;;  %v452_v11 = vld [vmem:[%s632_s1] sm:$0xff]  ;;  %v453_v12 = vld [vmem:[%s632_s1 + $0x8] sm:$0xff]  ;;  %v217_v13 = vld [vmem:[%s633_s2 + $0x18] sm:$0xff]  ;;  %s456_s12 = sshll.u32 (%p561_p5), %s416_s15, 4 }
  0x21   : > { %v215_v14 = vld [vmem:[%s633_s2 + $0x8] sm:$0xff]  ;;  %s328_s27 = scalar_lea.vmem (%p561_p5), %s634_s3, %s456_s12 }
  0x22   : > { %272 = vmatpush.bf16.msra.mxu0 %v437_v8  ;;  %457 = vmatpush.bf16.msra.mxu2 %v437_v8 }
  0x23   : > { %291 = vmatpush.bf16.msra.mxu1 %v441_v10  ;;  %458 = vmatpush.bf16.msra.mxu3 %v441_v10 }
  0x25   : > { %442 = vmatmul.msk.bf16.vlgmr.msra.gmra.mxu0 %vm258_vm0, %v452_v11  ;;  %443 = vmatmul.msk.bf16.vlgmr.msra.gmra.mxu2 %vm258_vm0, %v453_v12 }
  0x26   : > { %444 = vmatmul.msk.bf16.vlgmr.msra.gmra.mxu1 %vm258_vm0, %v452_v11  ;;  %445 = vmatmul.msk.bf16.vlgmr.msra.gmra.mxu3 %vm258_vm0, %v453_v12 }
  0x28   : > { %235 = vperm.xlu1 %485, %v217_v13   ;;  %225 = vperm.xlu0 %484, %v215_v14  }
  0x92   : > { %v221_v15 = vpop.permute.xlu0 %220  ;;  %v231_v21 = vpop.permute.xlu1 %230 }
  0x9a   : > { %v226_v26 = vpop.permute.xlu0 %225  ;;  %v236_v36 = vpop.permute.xlu1 %235 }
  0xa2   : > { %v274_v16 = vpop.f32.mrf.mxu0 }
  0xa3   : > { %v275_v17 = vadd.f32 %v274_v16, %v221_v15  ;;  %v293_v18 = vpop.f32.mrf.mxu1 }
  0xa4   : > { %v294_v19 = vadd.f32 %v293_v18, %v221_v15 }
  0xa5   : > { %v303_v20 = vmax.f32 %v275_v17, 0.0 }
  0xa6   : > { %v304_v22 = vmax.f32 %v294_v19, 0.0 }
  0xa7   : > { %311 = vst [vmem:[%s596_s24] sm:$0xff] %v303_v20 }
  0xa8   : > { %312 = vst [vmem:[%s596_s24 + $0x8] sm:$0xff] %v304_v22  ;;  %v279_v23 = vpop.f32.mrf.mxu2 }
  0xa9   : > { %v280_v24 = vadd.f32 %v279_v23, %v231_v21  ;;  %v298_v25 = vpop.f32.mrf.mxu3 }
  0xaa   : > { %v299_v27 = vadd.f32 %v298_v25, %v231_v21  ;;  %v276_v28 = vpop.f32.mrf.mxu0 }
  0xab   : > { %v307_v29 = vmax.f32 %v280_v24, 0.0  ;;  %v277_v30 = vadd.f32 %v276_v28, %v226_v26  ;;  %v295_v31 = vpop.f32.mrf.mxu1 }
  0xac   : > { %v308_v32 = vmax.f32 %v299_v27, 0.0  ;;  %v296_v33 = vadd.f32 %v295_v31, %v226_v26 }
  0xad   : > { %315 = vst [vmem:[%s596_s24 + $0x20] sm:$0xff] %v307_v29  ;;  %v305_v34 = vmax.f32 %v277_v30, 0.0 }
  0xae   : > { %316 = vst [vmem:[%s596_s24 + $0x28] sm:$0xff] %v308_v32  ;;  %v306_v35 = vmax.f32 %v296_v33, 0.0  ;;  %v341_v43 = vld [vmem:[%s596_s24] sm:$0xff] (%p561_p5) }
  0xaf   : > { %313 = vst [vmem:[%s596_s24 + $0x10] sm:$0xff] %v305_v34  ;;  %v343_v44 = vld [vmem:[%s596_s24 + $0x8] sm:$0xff] (%p561_p5) }
  0xb0   : > { %314 = vst [vmem:[%s596_s24 + $0x18] sm:$0xff] %v306_v35  ;;  %v281_v37 = vpop.f32.mrf.mxu2 }
  0xb1   : > { %v282_v38 = vadd.f32 %v281_v37, %v236_v36  ;;  %v300_v39 = vpop.f32.mrf.mxu3  ;;  %342 = vst [vmem:[%s328_s27] sm:$0xff] (%p561_p5), %v341_v43 }
  0xb2   : > { %v301_v40 = vadd.f32 %v300_v39, %v236_v36  ;;  %325 = sbr.rel (!%p561_p5) target bundleno = 191 (0xbf), region = 74  ;;  %344 = vst [vmem:[%s328_s27 + $0x8] sm:$0xff] (%p561_p5), %v343_v44 }
  0xb3   : > { %v309_v41 = vmax.f32 %v282_v38, 0.0 }
  0xb4   : > { %v310_v42 = vmax.f32 %v301_v40, 0.0  ;;  %v349_v47 = vld [vmem:[%s596_s24 + $0x20] sm:$0xff] (%p561_p5) }
  0xb5   : > { %317 = vst [vmem:[%s596_s24 + $0x30] sm:$0xff] %v309_v41  ;;  %v351_v48 = vld [vmem:[%s596_s24 + $0x28] sm:$0xff] (%p561_p5) }
  0xb6   : > { %318 = vst [vmem:[%s596_s24 + $0x38] sm:$0xff] %v310_v42  ;;  %v345_v45 = vld [vmem:[%s596_s24 + $0x10] sm:$0xff] (%p561_p5) }
  0xb7   : > { %v347_v46 = vld [vmem:[%s596_s24 + $0x18] sm:$0xff]  ;;  %346 = vst [vmem:[%s328_s27 + $0x20] sm:$0xff] %v345_v45 }
  0xb8   : > { %348 = vst [vmem:[%s328_s27 + $0x28] sm:$0xff] %v347_v46 }
  0xb9   : > { %350 = vst [vmem:[%s328_s27 + $0x40] sm:$0xff] %v349_v47 }
  0xba   : > { %352 = vst [vmem:[%s328_s27 + $0x48] sm:$0xff] %v351_v48 }
  0xbc   : > { %v353_v49 = vld [vmem:[%s596_s24 + $0x30] sm:$0xff] }
  0xbd   : > { %v355_v50 = vld [vmem:[%s596_s24 + $0x38] sm:$0xff]  ;;  %354 = vst [vmem:[%s328_s27 + $0x60] sm:$0xff] %v353_v49 }
  0xbe   : > { %356 = vst [vmem:[%s328_s27 + $0x68] sm:$0xff] %v355_v50 }
  0xbf PF: > { %p10_p10 = scmp.ge.s32.totalorder %s548_s16, 4   ;;  %s636_s12 = smov %s504_s13 }
  0xc0   : > { %s637_s13 = smov %s559_s19  ;;  %s638_s14 = smov %s548_s16 }
  0xc1   :  { %12 = sbr.rel (!%p10_p10) target bundleno = 2 (0x2), region = 128 }

</bundles_post_ra>
